<compile_context>
chip_gen: v7x
topology: tpu7x:2x2x1
jax: 0.10.0
libtpu: 0.0.40
codegen_flags: <defaults>
</compile_context>

<pallas_src>
import jax
import jax.numpy as jnp
from jax import lax
from jax.experimental import pallas as pl
from jax.experimental.pallas import tpu as pltpu


# ---------------------------------------------------------------------------
# Fused kernel: two [3x3 conv + folded BN affine + ReLU] stages per batch elem.
# ---------------------------------------------------------------------------
def _double_conv_kernel(x_ref, a1_ref, b1_ref, a2_ref, b2_ref, o_ref,
                        xp1_ref, xp2_ref):
    # x_ref  : (1, H, W*Cin)            un-padded input rows (f32)
    # a1_ref : (3, (W+2)*Cin,  W*Cmid)  banded stage-1 weights (bf16, BN scale folded)
    # b1_ref : (1, W*Cmid)              stage-1 folded bias, tiled over W (f32)
    # a2_ref : (3, (W+2)*Cmid, W*Cout)  banded stage-2 weights (bf16)
    # b2_ref : (1, W*Cout)              stage-2 folded bias (f32)
    # o_ref  : (1, H, W*Cout)           lane-dense output slab
    # xp1_ref: (H+16, (W+2)*Cin)  f32 VMEM scratch (padded stage-1 input)
    # xp2_ref: (H+16, (W+2)*Cmid) f32 VMEM scratch (padded intermediate act.)
    H = x_ref.shape[1]
    w_cin = x_ref.shape[2]
    w_cmid = b1_ref.shape[1]
    w_cout = o_ref.shape[2]

    # Zero-fill supplies both the row halo (rows outside [8, 8+H)) and the
    # column halo (lane blocks >= W*C).  Re-zeroed every grid step so
    # correctness never depends on which core executed step 0 (megacore-safe);
    # the buffers are only a few KiB.
    xp1_ref[...] = jnp.zeros_like(xp1_ref)
    xp2_ref[...] = jnp.zeros_like(xp2_ref)

    # Real image rows go at sublane-aligned offset 8, lane offset 0
    # (halo columns live at the *end* of the lane axis; the band matrices are
    #  built for that convention).
    xp1_ref[8:8 + H, 0:w_cin] = x_ref[0]

    def stage(xp_ref, a_ref, b_ref, n_out):
        acc = jnp.zeros((H, n_out), jnp.float32)
        for kh in range(3):                                   # rows h-1, h, h+1
            lhs = xp_ref[7 + kh:7 + kh + H, :].astype(jnp.bfloat16)
            acc = acc + jnp.dot(lhs, a_ref[kh],
                                preferred_element_type=jnp.float32)
        # folded conv-bias + BN shift, then ReLU (VPU)
        return jnp.maximum(acc + b_ref[...], 0.0)

    y1 = stage(xp1_ref, a1_ref, b1_ref, w_cmid)       # (H, W*Cmid) f32
    xp2_ref[8:8 + H, 0:w_cmid] = y1                   # intermediate stays in VMEM
    y2 = stage(xp2_ref, a2_ref, b2_ref, w_cout)       # (H, W*Cout)
    o_ref[0] = y2.astype(o_ref.dtype)


# ---------------------------------------------------------------------------
# Wrapper-side weight preparation.
# ---------------------------------------------------------------------------
def _fold_bn(conv_bias, gamma, beta, running_mean, running_var, eps=1e-5):
    """Fold conv bias + inference BatchNorm into per-channel (scale, shift)."""
    s = gamma / jnp.sqrt(running_var + eps)
    t = conv_bias * s + beta - running_mean * s
    return s, t


def _band_weights(w_oihw, scale, W):
    """OIHW 3x3 weight (with BN scale folded in) -> (3, (W+2)*Cin, W*Cout) bf16.

    A[kh, c*Cin+ci, w*Cout+co] = scale[co] * w[co, ci, kh, kw]  iff c == w+kw-1,
    matching an input row laid out as W lane-blocks of Cin channels followed by
    two zero halo blocks.
    """
    Cout, Cin, KH, KW = w_oihw.shape
    assert KH == 3 and KW == 3, "only 3x3 kernels (module default) supported"
    w_hwio = jnp.transpose(w_oihw, (2, 3, 1, 0)) * scale[None, None, None, :]
    # D[kw, c, w] = 1  iff  c == w + kw - 1
    D = jnp.stack([jnp.eye(W + 2, W, k=1 - kw, dtype=w_hwio.dtype)
                   for kw in range(KW)])
    A = jnp.einsum('kcw,hkio->hciwo', D, w_hwio)      # (3, W+2, Cin, W, Cout)
    return A.reshape(KH, (W + 2) * Cin, W * Cout).astype(jnp.bfloat16)


@jax.jit
def double_conv_forward(x_nchw, params):
    (w1, b1, bn1, w2, b2, bn2) = params
    N, Cin, H, W = x_nchw.shape
    Cmid = w1.shape[0]
    Cout = w2.shape[0]

    s1, t1 = _fold_bn(b1, *bn1)
    s2, t2 = _fold_bn(b2, *bn2)
    a1 = _band_weights(w1, s1, W)                         # (3, (W+2)*Cin,  W*Cmid)
    a2 = _band_weights(w2, s2, W)                         # (3, (W+2)*Cmid, W*Cout)
    b1t = jnp.tile(t1, W).reshape(1, W * Cmid).astype(jnp.float32)
    b2t = jnp.tile(t2, W).reshape(1, W * Cout).astype(jnp.float32)

    # NCHW -> NHWC -> rows flattened to (W*Cin) lanes; no jnp.pad here
    # (the halo is built inside the kernel).
    x_rows = jnp.transpose(x_nchw, (0, 2, 3, 1)).reshape(N, H, W * Cin)

    out = pl.pallas_call(
        _double_conv_kernel,
        out_shape=jax.ShapeDtypeStruct((N, H, W * Cout), jnp.float32),
        grid_spec=pltpu.PrefetchScalarGridSpec(
            num_scalar_prefetch=0,
            grid=(N,),
            in_specs=[
                pl.BlockSpec((1, H, W * Cin), lambda n: (n, 0, 0)),
                pl.BlockSpec((3, (W + 2) * Cin, W * Cmid), lambda n: (0, 0, 0)),
                pl.BlockSpec((1, W * Cmid), lambda n: (0, 0)),
                pl.BlockSpec((3, (W + 2) * Cmid, W * Cout), lambda n: (0, 0, 0)),
                pl.BlockSpec((1, W * Cout), lambda n: (0, 0)),
            ],
            out_specs=pl.BlockSpec((1, H, W * Cout), lambda n: (n, 0, 0)),
            scratch_shapes=[
                pltpu.VMEM((H + 16, (W + 2) * Cin), jnp.float32),
                pltpu.VMEM((H + 16, (W + 2) * Cmid), jnp.float32),
            ]),
        compiler_params=pltpu.CompilerParams(
            dimension_semantics=("parallel",),
            vmem_limit_bytes=32 * 1024 * 1024),
    )(x_rows, a1, b1t, a2, b2t)

    # (N, H, W*Cout) -> NHWC -> NCHW
    return jnp.transpose(out.reshape(N, H, W, Cout), (0, 3, 1, 2))


# ---------------------------------------------------------------------------
# Pure-JAX (f32) reference for the correctness check.
# ---------------------------------------------------------------------------
def _ref_double_conv(x_nchw, params):
    (w1, b1, bn1, w2, b2, bn2) = params

    def conv(x, w, b):
        y = lax.conv_general_dilated(
            x, w, window_strides=(1, 1), padding=((1, 1), (1, 1)),
            dimension_numbers=("NCHW", "OIHW", "NCHW"))
        return y + b[None, :, None, None]

    def bn(x, p, eps=1e-5):
        g, bt, m, v = p
        return ((x - m[None, :, None, None])
                / jnp.sqrt(v + eps)[None, :, None, None]
                * g[None, :, None, None] + bt[None, :, None, None])

    y = jax.nn.relu(bn(conv(x_nchw, w1, b1), bn1))
    y = jax.nn.relu(bn(conv(y, w2, b2), bn2))
    return y


if __name__ == "__main__":
    key = jax.random.PRNGKey(0)
    ks = jax.random.split(key, 12)

    N, Cin, Cout, H, W = 2, 4, 8, 16, 16

    # Deterministic synthetic parameters (shapes from Conv2d / BatchNorm2d).
    w1 = jax.random.normal(ks[0], (Cout, Cin, 3, 3), jnp.float32) * 0.1
    b1 = jax.random.normal(ks[1], (Cout,), jnp.float32) * 0.1
    bn1 = (jax.random.normal(ks[2], (Cout,), jnp.float32) * 0.1 + 1.0,    # gamma
           jax.random.normal(ks[3], (Cout,), jnp.float32) * 0.1,           # beta
           jax.random.normal(ks[4], (Cout,), jnp.float32) * 0.1,           # running_mean
           jnp.abs(jax.random.normal(ks[5], (Cout,), jnp.float32)) + 0.5)  # running_var

    w2 = jax.random.normal(ks[6], (Cout, Cout, 3, 3), jnp.float32) * 0.1
    b2 = jax.random.normal(ks[7], (Cout,), jnp.float32) * 0.1
    bn2 = (jax.random.normal(ks[8], (Cout,), jnp.float32) * 0.1 + 1.0,
           jax.random.normal(ks[9], (Cout,), jnp.float32) * 0.1,
           jax.random.normal(ks[10], (Cout,), jnp.float32) * 0.1,
           jnp.abs(jax.random.normal(ks[11], (Cout,), jnp.float32)) + 0.5)

    params = (w1, b1, bn1, w2, b2, bn2)

    x = jax.random.normal(jax.random.PRNGKey(42), (N, Cin, H, W), jnp.float32)

    out = jax.block_until_ready(double_conv_forward(x, params))
    ref = jax.block_until_ready(_ref_double_conv(x, params))

    assert out.shape == (N, Cout, H, W), out.shape
    # bf16 MXU operands (per perf guidance) vs. the pure-f32 reference:
    # tolerances relaxed accordingly; accumulation itself is f32.
    assert jnp.allclose(out, ref, rtol=2e-2, atol=3e-2), (
        float(jnp.max(jnp.abs(out - ref))))

    print("KERNEL_OK")
</pallas_src>

<mosaic_0001>
module attributes {stable_mosaic.version = 11 : i64} {
  func.func @_double_conv_kernel(%arg0: i32, %arg1: memref<1x16x64xf32, #tpu.memory_space<vmem>>, %arg2: memref<3x72x128xbf16, #tpu.memory_space<vmem>>, %arg3: memref<1x128xf32, #tpu.memory_space<vmem>>, %arg4: memref<3x144x128xbf16, #tpu.memory_space<vmem>>, %arg5: memref<1x128xf32, #tpu.memory_space<vmem>>, %arg6: memref<1x16x128xf32, #tpu.memory_space<vmem>>, %arg7: memref<32x72xf32, #tpu.memory_space<vmem>>, %arg8: memref<32x144xf32, #tpu.memory_space<vmem>>) attributes {dimension_semantics = [#tpu.dimension_semantics<parallel>], iteration_bounds = array<i64: 2>, scalar_prefetch = 0 : i64, scratch_operands = 2 : i64, tpu.core_type = #tpu.core_type<tc>, window_params = [{transform_indices = @transform_0, window_bounds = array<i64: 1, 16, 64>}, {pipeline_mode = #tpu.pipeline_mode<synchronous>, transform_indices = @transform_1, window_bounds = array<i64: 3, 72, 128>}, {pipeline_mode = #tpu.pipeline_mode<synchronous>, transform_indices = @transform_2, window_bounds = array<i64: 1, 128>}, {pipeline_mode = #tpu.pipeline_mode<synchronous>, transform_indices = @transform_3, window_bounds = array<i64: 3, 144, 128>}, {pipeline_mode = #tpu.pipeline_mode<synchronous>, transform_indices = @transform_4, window_bounds = array<i64: 1, 128>}, {transform_indices = @transform_5, window_bounds = array<i64: 1, 16, 128>}]} {
    %cst = arith.constant 0.000000e+00 : f32
    %0 = vector.broadcast %cst : f32 to vector<32x72xf32>
    %c0 = arith.constant 0 : index
    %c0_0 = arith.constant 0 : index
    %1 = vector.load %arg7[%c0, %c0_0] : memref<32x72xf32, #tpu.memory_space<vmem>>, vector<32x72xf32>
    tpu.vector_store %arg7[%c0, %c0_0], %0 {strides = array<i32>} : memref<32x72xf32, #tpu.memory_space<vmem>>, vector<32x72xf32>,
    %cst_1 = arith.constant 0.000000e+00 : f32
    %2 = vector.broadcast %cst_1 : f32 to vector<32x144xf32>
    %c0_2 = arith.constant 0 : index
    %c0_3 = arith.constant 0 : index
    %3 = vector.load %arg8[%c0_2, %c0_3] : memref<32x144xf32, #tpu.memory_space<vmem>>, vector<32x144xf32>
    tpu.vector_store %arg8[%c0_2, %c0_3], %2 {strides = array<i32>} : memref<32x144xf32, #tpu.memory_space<vmem>>, vector<32x144xf32>,
    %c0_4 = arith.constant 0 : index
    %c0_5 = arith.constant 0 : index
    %c0_6 = arith.constant 0 : index
    %4 = vector.load %arg1[%c0_4, %c0_5, %c0_6] : memref<1x16x64xf32, #tpu.memory_space<vmem>>, vector<1x16x64xf32>
    %5 = vector.shape_cast %4 : vector<1x16x64xf32> to vector<16x64xf32>
    %c8 = arith.constant 8 : index
    %c0_7 = arith.constant 0 : index
    %6 = vector.load %arg7[%c8, %c0_7] : memref<32x72xf32, #tpu.memory_space<vmem>>, vector<16x64xf32>
    tpu.vector_store %arg7[%c8, %c0_7], %5 {strides = array<i32>} : memref<32x72xf32, #tpu.memory_space<vmem>>, vector<16x64xf32>,
    %cst_8 = arith.constant 0.000000e+00 : f32
    %7 = vector.broadcast %cst_8 : f32 to vector<16x128xf32>
    %c7 = arith.constant 7 : index
    %c0_9 = arith.constant 0 : index
    %8 = vector.load %arg7[%c7, %c0_9] : memref<32x72xf32, #tpu.memory_space<vmem>>, vector<16x72xf32>
    %9 = arith.truncf %8 : vector<16x72xf32> to vector<16x72xbf16>
    %c0_10 = arith.constant 0 : index
    %c0_11 = arith.constant 0 : index
    %c0_12 = arith.constant 0 : index
    %10 = vector.load %arg2[%c0_10, %c0_11, %c0_12] : memref<3x72x128xbf16, #tpu.memory_space<vmem>>, vector<1x72x128xbf16>
    %11 = vector.shape_cast %10 : vector<1x72x128xbf16> to vector<72x128xbf16>
    %cst_13 = arith.constant dense<0.000000e+00> : vector<16x128xf32>
    %12 = tpu.matmul %9, %11, %cst_13 {dimension_numbers = #tpu.dot_dimension_numbers<[1], [0], [0], [1], [0, 0, 1, 1], [], []>} : vector<16x72xbf16>, vector<72x128xbf16>, vector<16x128xf32> -> vector<16x128xf32>
    %13 = arith.addf %7, %12 : vector<16x128xf32>
    %c8_14 = arith.constant 8 : index
    %c0_15 = arith.constant 0 : index
    %14 = vector.load %arg7[%c8_14, %c0_15] : memref<32x72xf32, #tpu.memory_space<vmem>>, vector<16x72xf32>
    %15 = arith.truncf %14 : vector<16x72xf32> to vector<16x72xbf16>
    %c1 = arith.constant 1 : index
    %c0_16 = arith.constant 0 : index
    %c0_17 = arith.constant 0 : index
    %16 = vector.load %arg2[%c1, %c0_16, %c0_17] : memref<3x72x128xbf16, #tpu.memory_space<vmem>>, vector<1x72x128xbf16>
    %17 = vector.shape_cast %16 : vector<1x72x128xbf16> to vector<72x128xbf16>
    %cst_18 = arith.constant dense<0.000000e+00> : vector<16x128xf32>
    %18 = tpu.matmul %15, %17, %cst_18 {dimension_numbers = #tpu.dot_dimension_numbers<[1], [0], [0], [1], [0, 0, 1, 1], [], []>} : vector<16x72xbf16>, vector<72x128xbf16>, vector<16x128xf32> -> vector<16x128xf32>
    %19 = arith.addf %13, %18 : vector<16x128xf32>
    %c9 = arith.constant 9 : index
    %c0_19 = arith.constant 0 : index
    %20 = vector.load %arg7[%c9, %c0_19] : memref<32x72xf32, #tpu.memory_space<vmem>>, vector<16x72xf32>
    %21 = arith.truncf %20 : vector<16x72xf32> to vector<16x72xbf16>
    %c2 = arith.constant 2 : index
    %c0_20 = arith.constant 0 : index
    %c0_21 = arith.constant 0 : index
    %22 = vector.load %arg2[%c2, %c0_20, %c0_21] : memref<3x72x128xbf16, #tpu.memory_space<vmem>>, vector<1x72x128xbf16>
    %23 = vector.shape_cast %22 : vector<1x72x128xbf16> to vector<72x128xbf16>
    %cst_22 = arith.constant dense<0.000000e+00> : vector<16x128xf32>
    %24 = tpu.matmul %21, %23, %cst_22 {dimension_numbers = #tpu.dot_dimension_numbers<[1], [0], [0], [1], [0, 0, 1, 1], [], []>} : vector<16x72xbf16>, vector<72x128xbf16>, vector<16x128xf32> -> vector<16x128xf32>
    %25 = arith.addf %19, %24 : vector<16x128xf32>
    %c0_23 = arith.constant 0 : index
    %c0_24 = arith.constant 0 : index
    %26 = vector.load %arg3[%c0_23, %c0_24] : memref<1x128xf32, #tpu.memory_space<vmem>>, vector<1x128xf32>
    %27 = vector.broadcast %26 : vector<1x128xf32> to vector<16x128xf32>
    %28 = arith.addf %25, %27 : vector<16x128xf32>
    %cst_25 = arith.constant 0.000000e+00 : f32
    %29 = vector.broadcast %cst_25 : f32 to vector<16x128xf32>
    %30 = arith.maximumf %28, %29 : vector<16x128xf32>
    %c8_26 = arith.constant 8 : index
    %c0_27 = arith.constant 0 : index
    %31 = vector.load %arg8[%c8_26, %c0_27] : memref<32x144xf32, #tpu.memory_space<vmem>>, vector<16x128xf32>
    tpu.vector_store %arg8[%c8_26, %c0_27], %30 {strides = array<i32>} : memref<32x144xf32, #tpu.memory_space<vmem>>, vector<16x128xf32>,
    %cst_28 = arith.constant 0.000000e+00 : f32
    %32 = vector.broadcast %cst_28 : f32 to vector<16x128xf32>
    %c7_29 = arith.constant 7 : index
    %c0_30 = arith.constant 0 : index
    %33 = vector.load %arg8[%c7_29, %c0_30] : memref<32x144xf32, #tpu.memory_space<vmem>>, vector<16x144xf32>
    %34 = arith.truncf %33 : vector<16x144xf32> to vector<16x144xbf16>
    %c0_31 = arith.constant 0 : index
    %c0_32 = arith.constant 0 : index
    %c0_33 = arith.constant 0 : index
    %35 = vector.load %arg4[%c0_31, %c0_32, %c0_33] : memref<3x144x128xbf16, #tpu.memory_space<vmem>>, vector<1x144x128xbf16>
    %36 = vector.shape_cast %35 : vector<1x144x128xbf16> to vector<144x128xbf16>
    %cst_34 = arith.constant dense<0.000000e+00> : vector<16x128xf32>
    %37 = tpu.matmul %34, %36, %cst_34 {dimension_numbers = #tpu.dot_dimension_numbers<[1], [0], [0], [1], [0, 0, 1, 1], [], []>} : vector<16x144xbf16>, vector<144x128xbf16>, vector<16x128xf32> -> vector<16x128xf32>
    %38 = arith.addf %32, %37 : vector<16x128xf32>
    %c8_35 = arith.constant 8 : index
    %c0_36 = arith.constant 0 : index
    %39 = vector.load %arg8[%c8_35, %c0_36] : memref<32x144xf32, #tpu.memory_space<vmem>>, vector<16x144xf32>
    %40 = arith.truncf %39 : vector<16x144xf32> to vector<16x144xbf16>
    %c1_37 = arith.constant 1 : index
    %c0_38 = arith.constant 0 : index
    %c0_39 = arith.constant 0 : index
    %41 = vector.load %arg4[%c1_37, %c0_38, %c0_39] : memref<3x144x128xbf16, #tpu.memory_space<vmem>>, vector<1x144x128xbf16>
    %42 = vector.shape_cast %41 : vector<1x144x128xbf16> to vector<144x128xbf16>
    %cst_40 = arith.constant dense<0.000000e+00> : vector<16x128xf32>
    %43 = tpu.matmul %40, %42, %cst_40 {dimension_numbers = #tpu.dot_dimension_numbers<[1], [0], [0], [1], [0, 0, 1, 1], [], []>} : vector<16x144xbf16>, vector<144x128xbf16>, vector<16x128xf32> -> vector<16x128xf32>
    %44 = arith.addf %38, %43 : vector<16x128xf32>
    %c9_41 = arith.constant 9 : index
    %c0_42 = arith.constant 0 : index
    %45 = vector.load %arg8[%c9_41, %c0_42] : memref<32x144xf32, #tpu.memory_space<vmem>>, vector<16x144xf32>
    %46 = arith.truncf %45 : vector<16x144xf32> to vector<16x144xbf16>
    %c2_43 = arith.constant 2 : index
    %c0_44 = arith.constant 0 : index
    %c0_45 = arith.constant 0 : index
    %47 = vector.load %arg4[%c2_43, %c0_44, %c0_45] : memref<3x144x128xbf16, #tpu.memory_space<vmem>>, vector<1x144x128xbf16>
    %48 = vector.shape_cast %47 : vector<1x144x128xbf16> to vector<144x128xbf16>
    %cst_46 = arith.constant dense<0.000000e+00> : vector<16x128xf32>
    %49 = tpu.matmul %46, %48, %cst_46 {dimension_numbers = #tpu.dot_dimension_numbers<[1], [0], [0], [1], [0, 0, 1, 1], [], []>} : vector<16x144xbf16>, vector<144x128xbf16>, vector<16x128xf32> -> vector<16x128xf32>
    %50 = arith.addf %44, %49 : vector<16x128xf32>
    %c0_47 = arith.constant 0 : index
    %c0_48 = arith.constant 0 : index
    %51 = vector.load %arg5[%c0_47, %c0_48] : memref<1x128xf32, #tpu.memory_space<vmem>>, vector<1x128xf32>
    %52 = vector.broadcast %51 : vector<1x128xf32> to vector<16x128xf32>
    %53 = arith.addf %50, %52 : vector<16x128xf32>
    %cst_49 = arith.constant 0.000000e+00 : f32
    %54 = vector.broadcast %cst_49 : f32 to vector<16x128xf32>
    %55 = arith.maximumf %53, %54 : vector<16x128xf32>
    %c0_50 = arith.constant 0 : index
    %c0_51 = arith.constant 0 : index
    %c0_52 = arith.constant 0 : index
    %56 = vector.load %arg6[%c0_50, %c0_51, %c0_52] : memref<1x16x128xf32, #tpu.memory_space<vmem>>, vector<1x16x128xf32>
    %57 = vector.shape_cast %56 : vector<1x16x128xf32> to vector<16x128xf32>
    %58 = vector.shape_cast %55 : vector<16x128xf32> to vector<1x16x128xf32>
    tpu.vector_store %arg6[%c0_50, %c0_51, %c0_52], %58 {strides = array<i32>} : memref<1x16x128xf32, #tpu.memory_space<vmem>>, vector<1x16x128xf32>,
    return
  }
  func.func @transform_0(%arg0: i32) -> (i32, i32, i32) {
    %c0_i32 = arith.constant 0 : i32
    %c0_i32_0 = arith.constant 0 : i32
    %c0_i32_1 = arith.constant 0 : i32
    return %arg0, %c0_i32, %c0_i32_0 : i32, i32, i32
  }
  func.func @transform_1(%arg0: i32) -> (i32, i32, i32) {
    %c0_i32 = arith.constant 0 : i32
    %c0_i32_0 = arith.constant 0 : i32
    %c0_i32_1 = arith.constant 0 : i32
    %c0_i32_2 = arith.constant 0 : i32
    return %c0_i32, %c0_i32_0, %c0_i32_1 : i32, i32, i32
  }
  func.func @transform_2(%arg0: i32) -> (i32, i32) {
    %c0_i32 = arith.constant 0 : i32
    %c0_i32_0 = arith.constant 0 : i32
    %c0_i32_1 = arith.constant 0 : i32
    return %c0_i32, %c0_i32_0 : i32, i32
  }
  func.func @transform_3(%arg0: i32) -> (i32, i32, i32) {
    %c0_i32 = arith.constant 0 : i32
    %c0_i32_0 = arith.constant 0 : i32
    %c0_i32_1 = arith.constant 0 : i32
    %c0_i32_2 = arith.constant 0 : i32
    return %c0_i32, %c0_i32_0, %c0_i32_1 : i32, i32, i32
  }
  func.func @transform_4(%arg0: i32) -> (i32, i32) {
    %c0_i32 = arith.constant 0 : i32
    %c0_i32_0 = arith.constant 0 : i32
    %c0_i32_1 = arith.constant 0 : i32
    return %c0_i32, %c0_i32_0 : i32, i32
  }
  func.func @transform_5(%arg0: i32) -> (i32, i32, i32) {
    %c0_i32 = arith.constant 0 : i32
    %c0_i32_0 = arith.constant 0 : i32
    %c0_i32_1 = arith.constant 0 : i32
    return %arg0, %c0_i32, %c0_i32_0 : i32, i32, i32
  }
}

</mosaic_0001>

<bundles_post_ra>
// kernel: tile.13
= control target key start
LH: loop header
LB: loop body
LE: loop exit
PB: predicated region body
PF: predicated region fallthrough
CT: control target
= control target key end

     0   :  { %s28_s0 = inlined_call_operand.vmem [shape: f32[8], index: 0, kind: input, shape index: {}]   ;;  %s29_s1 = inlined_call_operand.vmem [shape: f32[16,8], index: 1, kind: output, shape index: {}]  }
   0x1   :  { %v4_v0 = vld [vmem:[%s28_s0] ss:$0 sm:$0xff] }
   0x2   :  { %5 = vst [vmem:[%s29_s1] sm:$0xff] %v4_v0  ;;  %8 = vst [vmem:[%s29_s1 + $0x8] sm:$0xff] %v4_v0 }

// kernel: tile.14
= control target key start
LH: loop header
LB: loop body
LE: loop exit
PB: predicated region body
PF: predicated region fallthrough
CT: control target
= control target key end

     0   :  { %s131_s10 = smov 120   ;;  %s132_s11 = smov 104   ;;  %vm3_vm0 = vcmask 64512   ;;  %vm9_vm1 = vcmask 1048512   ;;  %vm15_vm2 = vcmask 982912   ;;  %vm21_vm3 = vcmask 917312   ;;  %s207_s0 = inlined_call_operand.vmem [shape: f32[16,8], index: 0, kind: input, shape index: {}]   ;;  %s208_s1 = inlined_call_operand.vmem [shape: f32[1,128], index: 1, kind: output, shape index: {}]  }
   0x1   :  { %v101_v0 = vld [vmem:[%s207_s0 + $0xf] sm:$0x1]   ;;  %v103_v1 = vld [vmem:[%s207_s0 + $0xd] sm:$0x1]   ;;  %v102_v2 = vld [vmem:[%s207_s0 + $0xe] sm:$0x1]  }
   0x2   :  { %7 = vrot.lane.b32.xlu0 %v101_v0, %s131_s10  ;;  %19 = vrot.lane.b32.xlu1 %v103_v1, %s132_s11  ;;  %v104_v3 = vld [vmem:[%s207_s0 + $0xc] sm:$0x1]   ;;  %s133_s16 = smov 112   ;;  %s134_s17 = smov 96   ;;  %v105_v4 = vld [vmem:[%s207_s0 + $0xb] sm:$0x1]  }
   0x3   :  { %v106_v5 = vld [vmem:[%s207_s0 + $0xa] sm:$0x1]   ;;  %v2_v6 = vld [vmem:[%s207_s0] sm:$0x1]   ;;  %s135_s24 = smov 88   ;;  %s136_s25 = smov 80  }
   0x4   :  { %4 = vst.msk [vmem:[#allocation0] sm:$0x1] %vm3_vm0, %v2_v6   ;;  %v107_v7 = vld [vmem:[%s207_s0 + $0x9] sm:$0x1]   ;;  %v108_v8 = vld [vmem:[%s207_s0 + $0x8] sm:$0x1]  }
   0x5   :  { %s137_s30 = smov 72   ;;  %s138_s2 = smov 64   ;;  %v109_v9 = vld [vmem:[%s207_s0 + $0x7] sm:$0x1]   ;;  %v110_v10 = vld [vmem:[%s207_s0 + $0x6] sm:$0x1]  }
   0x6   :  { %13 = vrot.lane.b32.xlu0 %v102_v2, %s133_s16  ;;  %25 = vrot.lane.b32.xlu1 %v104_v3, %s134_s17  ;;  %s139_s7 = smov 56   ;;  %s140_s8 = smov 48   ;;  %v111_v11 = vld [vmem:[%s207_s0 + $0x5] sm:$0x1]   ;;  %v112_v12 = vld [vmem:[%s207_s0 + $0x4] sm:$0x1]  }
   0x7   :  { %s141_s13 = smov 40   ;;  %s142_s14 = smov 32   ;;  %v113_v13 = vld [vmem:[%s207_s0 + $0x3] sm:$0x1]   ;;  %v114_v14 = vld [vmem:[%s207_s0 + $0x2] sm:$0x1]  }
   0x8   :  { %s143_s19 = smov 24   ;;  %s144_s20 = smov 16   ;;  %v115_v15 = vld [vmem:[%s207_s0 + $0x1] sm:$0x1]   ;;  %vm27_vm4 = vcmask 851712   ;;  %vm33_vm5 = vcmask 786112  }
   0x9   :  { %s145_s0 = smov 8   ;;  %vm39_vm6 = vcmask 720512   ;;  %vm45_vm7 = vcmask 654912   ;;  %vm51_vm8 = vcmask 589312   ;;  %vm57_vm9 = vcmask 523712  }
   0xa   :  { %31 = vrot.lane.b32.xlu0 %v105_v4, %s135_s24  ;;  %37 = vrot.lane.b32.xlu1 %v106_v5, %s136_s25  ;;  %vm63_vm10 = vcmask 458112   ;;  %vm69_vm11 = vcmask 392512   ;;  %vm75_vm12 = vcmask 326912   ;;  %vm81_vm13 = vcmask 261312  }
   0xb   :  { %vm87_vm14 = vcmask 195712   ;;  %vm93_vm15 = vcmask 130112  }
   0xe   :  { %43 = vrot.lane.b32.xlu0 %v107_v7, %s137_s30  ;;  %49 = vrot.lane.b32.xlu1 %v108_v8, %s138_s2 }
  0x12   :  { %55 = vrot.lane.b32.xlu0 %v109_v9, %s139_s7  ;;  %61 = vrot.lane.b32.xlu1 %v110_v10, %s140_s8 }
  0x16   :  { %67 = vrot.lane.b32.xlu0 %v111_v11, %s141_s13  ;;  %73 = vrot.lane.b32.xlu1 %v112_v12, %s142_s14 }
  0x1a   :  { %79 = vrot.lane.b32.xlu0 %v113_v13, %s143_s19  ;;  %85 = vrot.lane.b32.xlu1 %v114_v14, %s144_s20 }
  0x1e   :  { %91 = vrot.lane.b32.xlu0 %v115_v15, %s145_s0 }
  0x74   :  { %v8_v16 = vpop.permute.xlu0 %7   ;;  %v20_v17 = vpop.permute.xlu1 %19  }
  0x75   :  { %10 = vst.msk [vmem:[#allocation0] sm:$0x1] %vm9_vm1, %v8_v16  }
  0x78   :  { %v14_v18 = vpop.permute.xlu0 %13   ;;  %v26_v19 = vpop.permute.xlu1 %25  }
  0x79   :  { %16 = vst.msk [vmem:[#allocation0] sm:$0x1] %vm15_vm2, %v14_v18  }
  0x7a   :  { %22 = vst.msk [vmem:[#allocation0] sm:$0x1] %vm21_vm3, %v20_v17  }
  0x7b   :  { %28 = vst.msk [vmem:[#allocation0] sm:$0x1] %vm27_vm4, %v26_v19  }
  0x7c   :  { %v32_v20 = vpop.permute.xlu0 %31   ;;  %v38_v21 = vpop.permute.xlu1 %37  }
  0x7d   :  { %34 = vst.msk [vmem:[#allocation0] sm:$0x1] %vm33_vm5, %v32_v20  }
  0x7e   :  { %40 = vst.msk [vmem:[#allocation0] sm:$0x1] %vm39_vm6, %v38_v21  }
  0x80   :  { %v44_v22 = vpop.permute.xlu0 %43   ;;  %v50_v23 = vpop.permute.xlu1 %49  }
  0x81   :  { %46 = vst.msk [vmem:[#allocation0] sm:$0x1] %vm45_vm7, %v44_v22  }
  0x82   :  { %52 = vst.msk [vmem:[#allocation0] sm:$0x1] %vm51_vm8, %v50_v23  }
  0x84   :  { %v56_v24 = vpop.permute.xlu0 %55   ;;  %v62_v25 = vpop.permute.xlu1 %61  }
  0x85   :  { %58 = vst.msk [vmem:[#allocation0] sm:$0x1] %vm57_vm9, %v56_v24  }
  0x86   :  { %64 = vst.msk [vmem:[#allocation0] sm:$0x1] %vm63_vm10, %v62_v25  }
  0x88   :  { %v68_v26 = vpop.permute.xlu0 %67   ;;  %v74_v27 = vpop.permute.xlu1 %73  }
  0x89   :  { %70 = vst.msk [vmem:[#allocation0] sm:$0x1] %vm69_vm11, %v68_v26  }
  0x8a   :  { %76 = vst.msk [vmem:[#allocation0] sm:$0x1] %vm75_vm12, %v74_v27  }
  0x8c   :  { %v80_v28 = vpop.permute.xlu0 %79   ;;  %v86_v29 = vpop.permute.xlu1 %85  }
  0x8d   :  { %82 = vst.msk [vmem:[#allocation0] sm:$0x1] %vm81_vm13, %v80_v28  }
  0x8e   :  { %88 = vst.msk [vmem:[#allocation0] sm:$0x1] %vm87_vm14, %v86_v29  }
  0x90   :  { %v92_v30 = vpop.permute.xlu0 %91  }
  0x91   :  { %94 = vst.msk [vmem:[#allocation0] sm:$0x1] %vm93_vm15, %v92_v30  }
  0x98   :  { %v98_v31 = vld [vmem:[#allocation0] sm:$0x1] }
  0x99   :  { %100 = vst [vmem:[%s208_s1] sm:$0x1] %v98_v31 }

// kernel: double_conv_forward.1
= control target key start
LH: loop header
LB: loop body
LE: loop exit
PB: predicated region body
PF: predicated region fallthrough
CT: control target
= control target key end

     0   :  { %s1298_s18 = smov 0   ;;  %s1533_s0 = inlined_call_operand.vmem [shape: f32[2,16,64], index: 0, kind: input, shape index: {}]   ;;  %s1534_s1 = inlined_call_operand.vmem [shape: bf16[3,72,128], index: 1, kind: input, shape index: {}]   ;;  %s1535_s2 = inlined_call_operand.vmem [shape: f32[1,128], index: 2, kind: input, shape index: {}]   ;;  %s1536_s3 = inlined_call_operand.vmem [shape: bf16[3,144,128], index: 3, kind: input, shape index: {}]   ;;  %s1537_s4 = inlined_call_operand.vmem [shape: f32[1,128], index: 4, kind: input, shape index: {}]   ;;  %s1538_s5 = inlined_call_operand.vmem [shape: f32[2,16,128], index: 5, kind: output, shape index: {}]  }
   0x1 LB: > { %s1027_s19 = sadd.s32 4294967295, %s1263_s18   ;;  %p1031_p0 = scmp.ge.s32.totalorder %s1263_s18, 1  ;;  %s1263_s18 = sphi %s1298_s18, %s15_s18  }
   0x2   : > { %p187_p1 = scmp.lt.s32.totalorder %s1263_s18, 3 }
   0x4   : > { %p188_p2 = pnand %p1031_p0, %p187_p1 }
   0x5   : > { %v1215_v0 = vld [vmem:[%s1534_s1 + $0x24] sm:$0xff] (!%p188_p2)   ;;  %v1265_v1 = vmov (!%p188_p2), 0.0   ;;  %v1217_v3 = vld [vmem:[%s1534_s1 + $0x2c] sm:$0xff] (!%p188_p2)   ;;  %p215_p3 = scmp.lt.s32.totalorder (!%p188_p2), %s1027_s19, 1  ;;  %vm1266_vm0 = vmmov (!%p188_p2), 0   ;;  %vm226_vm1 = vcmask (!%p188_p2), 588800  }
   0x6   : > { %191 = sbr.rel (%p188_p2) target bundleno = 526 (0x20e), region = 40  ;;  %1162 = vmatprep.subr.bf16.mxu0 (!%p188_p2), %v1265_v1  ;;  %231 = vst [vmem:[#allocation3] sm:$0xff] (!%p188_p2), %v1265_v1  ;;  %238 = vst [vmem:[#allocation3 + $0x30] sm:$0xff] (!%p188_p2), %v1265_v1  ;;  %1176 = vmatprep.subr.bf16.mxu1 (!%p188_p2), %v1265_v1  ;;  %v1216_v2 = vld [vmem:[%s1534_s1] sm:$0xff] (!%p188_p2)   ;;  %v1218_v4 = vld [vmem:[%s1534_s1 + $0x8] sm:$0xff] (!%p188_p2)   ;;  %vm242_vm2 = vcmask (!%p188_p2), 523264  }
   0x7   : > { %1163 = vmatpush3.bf16.msra.mxu0 (!%p188_p2), %v1215_v0  ;;  %1177 = vmatpush3.bf16.msra.mxu1 (!%p188_p2), %v1216_v2  ;;  %v1219_v5 = vld [vmem:[%s1534_s1 + $0x34] sm:$0xff] (!%p188_p2)   ;;  %227 = vst.msk [vmem:[#allocation2] sm:$0xff] (!%p188_p2), %vm226_vm1, %v1265_v1  ;;  %228 = vst.msk [vmem:[#allocation2 + $0x8] sm:$0xff] (!%p188_p2), %vm226_vm1, %v1265_v1  ;;  %v1221_v7 = vld [vmem:[%s1534_s1 + $0x3c] sm:$0xff] (!%p188_p2)   ;;  %vm300_vm3 = vcmask (!%p188_p2), 1043456   ;;  %v1267_v31 = vmov (!%p188_p2), 0  }
   0x8   : > { %1164 = vmatprep.subr.bf16.mxu0 (!%p188_p2), %v1265_v1  ;;  %1178 = vmatprep.subr.bf16.mxu1 (!%p188_p2), %v1265_v1  ;;  %229 = vst.msk [vmem:[#allocation2 + $0x10] sm:$0xff] (!%p188_p2), %vm226_vm1, %v1265_v1  ;;  %230 = vst.msk [vmem:[#allocation2 + $0x18] sm:$0xff] (!%p188_p2), %vm226_vm1, %v1265_v1  ;;  %v1220_v6 = vld [vmem:[%s1534_s1 + $0x10] sm:$0xff] (!%p188_p2)   ;;  %v1223_v10 = vld [vmem:[%s1534_s1 + $0x44] ss:$0 sps:$4 sm:$0xff] (!%p188_p2)   ;;  %vm232_vm4 = vcmask (!%p188_p2), 130048  }
   0x9   : > { %1172 = vmatprep.mubr.msk.bf16.mxu0 (!%p188_p2), %vm1266_vm0, %v1265_v1  ;;  %1186 = vmatprep.mubr.msk.bf16.mxu1 (!%p188_p2), %vm1266_vm0, %v1265_v1  ;;  %v1222_v11 = vld [vmem:[%s1534_s1 + $0x18] sm:$0xff] (!%p188_p2)   ;;  %v1224_v12 = vld [vmem:[%s1534_s1 + $0x20] ss:$0 sps:$4 sm:$0xff] (!%p188_p2)   ;;  %v302_v13 = vsel (!%p188_p2), %vm300_vm3, %v1223_v10, 0  ;;  %v1225_v20 = vld [vmem:[%s1534_s1 + $0x48] sm:$0xff] (!%p188_p2)   ;;  %233 = vst.msk [vmem:[#allocation3 + $0x8] sm:$0xff] (!%p188_p2), %vm232_vm4, %v1265_v1 }
   0xa   : > { %v376_v14 = vsel (!%p188_p2), %vm300_vm3, %v1224_v12, 0  ;;  %v1226_v22 = vld [vmem:[%s1534_s1 + $0x50] sm:$0xff] (!%p188_p2)   ;;  %v1227_v23 = vld [vmem:[%s1534_s1 + $0x58] sm:$0xff] (!%p188_p2)   ;;  %v1228_v24 = vld [vmem:[%s1534_s1 + $0x60] sm:$0xff] (!%p188_p2)   ;;  %235 = vst.msk [vmem:[#allocation3 + $0x18] sm:$0xff] (!%p188_p2), %vm232_vm4, %v1265_v1 }
   0xb   : > { %1165 = vmatpush3.bf16.msra.mxu0 (!%p188_p2), %v1217_v3  ;;  %1179 = vmatpush3.bf16.msra.mxu1 (!%p188_p2), %v1218_v4  ;;  %v1229_v25 = vld [vmem:[%s1534_s1 + $0x68] ss:$0 sps:$4 sm:$0xff] (!%p188_p2)   ;;  %v1231_v32 = vld [vmem:[%s1536_s3 + $0x50] sm:$0xff] (!%p188_p2)   ;;  %v1232_v33 = vld [vmem:[%s1536_s3 + $0x58] sm:$0xff] (!%p188_p2)   ;;  %237 = vst.msk [vmem:[#allocation3 + $0x28] sm:$0xff] (!%p188_p2), %vm232_vm4, %v1265_v1 }
   0xc   : > { %1166 = vmatprep.subr.bf16.mxu0 (!%p188_p2), %v1265_v1  ;;  %1180 = vmatprep.subr.bf16.mxu1 (!%p188_p2), %v1265_v1  ;;  %v463_v28 = vsel (!%p188_p2), %vm300_vm3, %v1229_v25, 0  ;;  %v1230_v30 = vld [vmem:[%s1536_s3 + $0x48] sm:$0xff] (!%p188_p2)   ;;  %v1233_v34 = vld [vmem:[%s1536_s3] sm:$0xff] (!%p188_p2)   ;;  %v1237_v38 = vld [vmem:[%s1536_s3 + $0x10] sm:$0xff] (!%p188_p2)   ;;  %239 = vst.msk [vmem:[#allocation3 + $0x38] sm:$0xff] (!%p188_p2), %vm232_vm4, %v1265_v1 }
   0xd   : > { %s1540_s19 = smov (!%p215_p3, %s1027_s19), 1  ;;  %v1234_v35 = vld [vmem:[%s1536_s3 + $0x60] sm:$0xff]   ;;  %v1235_v36 = vld [vmem:[%s1536_s3 + $0x8] sm:$0xff]   ;;  %v1238_v39 = vld [vmem:[%s1536_s3 + $0x70] sm:$0xff]   ;;  %vm670_vm5 = vsmask.f32 4352 }
   0xe   : > { %s1142_s7 = sshll.u32 %s1540_s19, 4  ;;  %v1236_v37 = vld [vmem:[%s1536_s3 + $0x68] sm:$0xff]   ;;  %v1240_v40 = vld [vmem:[%s1536_s3 + $0x78] sm:$0xff]   ;;  %v1242_v42 = vld [vmem:[%s1536_s3 + $0x80] sm:$0xff]   ;;  %vm833_vm6 = vsmask.f32 7424 }
   0xf   : > { %s219_s10 = scalar_lea.vmem %s1533_s0, %s1142_s7  ;;  %1167 = vmatpush3.bf16.msra.mxu0 %v1219_v5  ;;  %1181 = vmatpush3.bf16.msra.mxu1 %v1220_v6  ;;  %v1239_v41 = vld [vmem:[%s1536_s3 + $0x18] sm:$0xff]   ;;  %v1241_v43 = vld [vmem:[%s1536_s3 + $0x20] sm:$0xff]   ;;  %v1244_v44 = vld [vmem:[%s1536_s3 + $0x88] sm:$0xff]   ;;  %s224_s25 = scalar_lea.vmem %s1538_s5, %s1142_s7 }
  0x10   : > { %v240_v8 = vld [vmem:[%s219_s10] sm:$0xff]  ;;  %v241_v9 = vld [vmem:[%s219_s10 + $0x8] sm:$0xff]  ;;  %1168 = vmatprep.subr.bf16.mxu0 %v1265_v1  ;;  %1182 = vmatprep.subr.bf16.mxu1 %v1265_v1  ;;  %v1245_v50 = vld [vmem:[%s1536_s3 + $0x30] sm:$0xff]  }
  0x11   : > { %243 = vst.msk [vmem:[#allocation2 + $0x8] sm:$0xff] %vm242_vm2, %v240_v8  ;;  %244 = vst.msk [vmem:[#allocation2 + $0x10] sm:$0xff] %vm242_vm2, %v241_v9  ;;  %v524_v45 = vld [vmem:[#allocation3 + $0x18] sm:$0xff]  ;;  %v1243_v47 = vld [vmem:[%s1536_s3 + $0x28] sm:$0xff]  }
  0x12   : > { %v550_v46 = vld [vmem:[#allocation3 + $0x28] sm:$0xff]  ;;  %v1246_v52 = vld [vmem:[%s1536_s3 + $0x38] sm:$0xff]   ;;  %v1248_v61 = vld [vmem:[%s1536_s3 + $0x40] sm:$0xff]  }
  0x13   : > { %1169 = vmatpush3.bf16.msra.mxu0 %v1221_v7  ;;  %1183 = vmatpush3.bf16.msra.mxu1 %v1222_v11  ;;  %v522_v48 = vld [vmem:[#allocation3 + $0x8] sm:$0x80]  ;;  %v552_v49 = vpack.c.bf16 %v550_v46, %v524_v45  ;;  %v526_v53 = vld [vmem:[#allocation3 + $0x28] sm:$0x7f] }
  0x14   : > { %1170 = vmatprep.subr.bf16.mxu0 %v1265_v1  ;;  %1184 = vmatprep.subr.bf16.mxu1 %v1265_v1  ;;  %v528_v51 = vpack.c.bf16 %v524_v45, %v522_v48  ;;  %v530_v56 = vpack.c.bf16 %v526_v53, %v526_v53 }
  0x16   : > { %v689_v54 = vshrl.u32 %v528_v51, 16  ;;  %v692_v55 = vshll.u32 %v528_v51, 16  ;;  %v697_v59 = vshrl.u32 %v530_v56, 16  ;;  %v700_v60 = vshll.u32 %v530_v56, 16 }
  0x17   : > { %1171 = vmatpush3.bf16.msra.mxu0 %v302_v13  ;;  %1185 = vmatpush3.bf16.msra.mxu1 %v376_v14  ;;  %v805_v13 = vld [vmem:[#allocation3 + $0x18] sm:$0xfe] }
  0x18   : > { %v257_v15 = vld [vmem:[#allocation2 + $0x8] sm:$0xff]  ;;  %v258_v16 = vld [vmem:[#allocation2 + $0x10] sm:$0xff]  ;;  %1190 = vmatprep.subr.bf16.mxu0 %v1265_v1  ;;  %629 = vmatprep.subr.bf16.mxu1 %v1267_v31  ;;  %v691_v57 = vrot.slane %v689_v54, 3  ;;  %v694_v58 = vrot.slane %v692_v55, 4  ;;  %v699_v63 = vrot.slane %v697_v59, 3  ;;  %v702_v0 = vrot.slane %v700_v60, 4 }
  0x19   : > { %v245_v17 = vld [vmem:[#allocation2 + $0x7] sm:$0xff]  ;;  %v259_v18 = vpack.c.bf16 %v258_v16, %v257_v15  ;;  %v246_v19 = vld [vmem:[#allocation2 + $0xf] sm:$0xff]  ;;  %v811_v14 = vpack.c.bf16 %v550_v46, %v805_v13  ;;  %v809_v15 = vld [vmem:[#allocation3 + $0x38] sm:$0x1] }
  0x1a   : > { %v247_v21 = vpack.c.bf16 %v246_v19, %v245_v17  ;;  %v419_v26 = vld [vmem:[#allocation2 + $0x9] sm:$0xff]  ;;  %v420_v27 = vld [vmem:[#allocation2 + $0x11] sm:$0xff]  ;;  %v695_v62 = vor.u32 %v694_v58, %v691_v57  ;;  %v813_v16 = vpack.c.bf16 %v809_v15, %v809_v15  ;;  %v1072_v19 = vld [vmem:[%s1535_s2] ss:$0 sm:$0xff] }
  0x1b   : > { %1173 = vmatmul.mubr.msk.bf16.vlgmr.msra.gmra.mrb[0].mxu0 %vm226_vm1, %v259_v18  ;;  %v421_v29 = vpack.c.bf16 %v420_v27, %v419_v26  ;;  %v849_v17 = vshll.u32 %v811_v14, 16  ;;  %v1252_v55 = vld [vmem:[%s1536_s3 + $0xb0] sm:$0xff]   ;;  %v1253_v58 = vld [vmem:[%s1536_s3 + $0xb8] sm:$0xff]  }
  0x1c   : > { %1187 = vmatmul.mubr.msk.bf16.vlgmr.msra.gmra.mrb[0].mxu1 %vm226_vm1, %v247_v21  ;;  %1191 = vmatpush3.bf16.msra.mxu0 %v1225_v20  ;;  %v808_v60 = vld [vmem:[#allocation3 + $0x30] sm:$0x1] }
  0x1d   : > { %1192 = vmatprep.subr.bf16.mxu0 %v1265_v1  ;;  %1200 = vmatprep.mubr.msk.bf16.mxu0 %vm1266_vm0, %v1265_v1 }
  0x1e   : > { %630 = vmatpush1.bf16.msra.mxu1 %v1230_v30  ;;  %1100 = vmatprep.mubr.msk.bf16.mxu1 %vm232_vm4, %v552_v49 }
  0x1f   : > { %631 = vmatprep.subr.bf16.mxu1 %v1267_v31 }
  0x20   : > { %1193 = vmatpush3.bf16.msra.mxu0 %v1226_v22  ;;  %v847_v22 = vshrl.u32 %v811_v14, 16 }
  0x21   : > { %1194 = vmatprep.subr.bf16.mxu0 %v1265_v1 }
  0x22   : > { %632 = vmatpush1.bf16.msra.mxu1 %v1231_v32 }
  0x23   : > { %633 = vmatprep.subr.bf16.mxu1 %v1267_v31 }
  0x24   : > { %1195 = vmatpush3.bf16.msra.mxu0 %v1227_v23  ;;  %v851_v23 = vrot.slane %v849_v17, 1 }
  0x25   : > { %1196 = vmatprep.subr.bf16.mxu0 %v1265_v1 }
  0x26   : > { %634 = vmatpush1.bf16.msra.mxu1 %v1232_v33  ;;  %v852_v32 = vor.u32 %v851_v23, %v847_v22 }
  0x27   : > { %635 = vmatprep.subr.bf16.mxu1 %v1267_v31 }
  0x28   : > { %1197 = vmatpush3.bf16.msra.mxu0 %v1228_v24  ;;  %v854_v24 = vshll.u32 %v813_v16, 16 }
  0x29   : > { %1198 = vmatprep.subr.bf16.mxu0 %v1265_v1  ;;  %v703_v1 = vor.u32 %v702_v0, %v699_v63  ;;  %v1255_v0 = vld [vmem:[%s1536_s3 + $0xc8] sm:$0xff]  }
  0x2a   : > { %636 = vmatpush1.bf16.msra.mxu1 %v1234_v35  ;;  %v856_v33 = vrot.slane %v854_v24, 1  ;;  %v521_v35 = vld [vmem:[#allocation3] sm:$0x80] }
  0x2b   : > { %637 = vmatprep.subr.bf16.mxu1 %v1267_v31  ;;  %v704_v2 = vsel %vm670_vm5, %v695_v62, %v703_v1  ;;  %v812_v62 = vpack.c.bf16 %v808_v60, %v808_v60 }
  0x2c   : > { %1199 = vmatpush3.bf16.msra.mxu0 %v463_v28 }
  0x2d   : > { %763 = vmatprep.subr.bf16.mxu0 %v1267_v31 }
  0x2e   : > { %638 = vmatpush1.bf16.msra.mxu1 %v1236_v37 }
  0x2f   : > { %1201 = vmatmul.mubr.msk.bf16.vlgmr.msra.gmra.mrb[4].mxu0 %vm226_vm1, %v421_v29  ;;  %639 = vmatprep.subr.bf16.mxu1 %v1267_v31 }
  0x30   : > { %764 = vmatpush1.bf16.msra.mxu0 %v1233_v34  ;;  %1110 = vmatprep.mubr.msk.bf16.mxu0 %vm232_vm4, %v704_v2  ;;  %v842_v2 = vshll.u32 %v812_v62, 16 }
  0x31   : > { %765 = vmatprep.subr.bf16.mxu0 %v1267_v31 }
  0x32   : > { %640 = vmatpush1.bf16.msra.mxu1 %v1238_v39 }
  0x33   : > { %641 = vmatprep.subr.bf16.mxu1 %v1267_v31 }
  0x34   : > { %766 = vmatpush1.bf16.msra.mxu0 %v1235_v36  ;;  %v1247_v36 = vld [vmem:[%s1536_s3 + $0x90] sm:$0xff]  }
  0x35   : > { %767 = vmatprep.subr.bf16.mxu0 %v1267_v31 }
  0x36   : > { %642 = vmatpush1.bf16.msra.mxu1 %v1240_v40  ;;  %v1249_v40 = vld [vmem:[%s1536_s3 + $0x98] sm:$0xff]  }
  0x37   : > { %643 = vmatprep.subr.bf16.mxu1 %v1267_v31 }
  0x38   : > { %768 = vmatpush1.bf16.msra.mxu0 %v1237_v38  ;;  %v857_v38 = vsel %vm833_vm6, %v852_v32, %v856_v33 }
  0x39   : > { %769 = vmatprep.subr.bf16.mxu0 %v1267_v31 }
  0x3a   : > { %644 = vmatpush1.bf16.msra.mxu1 %v1242_v42 }
  0x3b   : > { %645 = vmatprep.subr.bf16.mxu1 %v1267_v31 }
  0x3c   : > { %770 = vmatpush1.bf16.msra.mxu0 %v1239_v41 }
  0x3d   : > { %771 = vmatprep.subr.bf16.mxu0 %v1267_v31 }
  0x3e   : > { %646 = vmatpush1.bf16.msra.mxu1 %v1244_v44  ;;  %v1250_v44 = vld [vmem:[%s1536_s3 + $0xa0] sm:$0xff]  }
  0x3f   : > { %916 = vmatprep.subr.bf16.mxu1 %v1267_v31 }
  0x40   : > { %772 = vmatpush1.bf16.msra.mxu0 %v1241_v43 }
  0x41   : > { %773 = vmatprep.subr.bf16.mxu0 %v1267_v31 }
  0x44   : > { %774 = vmatpush1.bf16.msra.mxu0 %v1243_v47 }
  0x45   : > { %775 = vmatprep.subr.bf16.mxu0 %v1267_v31 }
  0x48   : > { %776 = vmatpush1.bf16.msra.mxu0 %v1245_v50  ;;  %v1251_v50 = vld [vmem:[%s1536_s3 + $0xa8] sm:$0xff]  }
  0x49   : > { %777 = vmatprep.subr.bf16.mxu0 %v1267_v31 }
  0x4c   : > { %778 = vmatpush1.bf16.msra.mxu0 %v1246_v52 }
  0x4d   : > { %779 = vmatprep.subr.bf16.mxu0 %v1267_v31 }
  0x50   : > { %780 = vmatpush1.bf16.msra.mxu0 %v1248_v61  ;;  %v1254_v61 = vld [vmem:[%s1536_s3 + $0xc0] sm:$0xff]  }
  0xee   : > { %v338_v3 = vpop.f32.mrb[0].mxu0 }
  0xef   : > { %v412_v4 = vpop.f32.mrb[0].mxu1  ;;  %v1174_v5 = vpop.f32.mrb[1].mxu0 }
  0xf0   : > { %v413_v6 = vadd.f32 %v412_v4, %v338_v3  ;;  %v1188_v7 = vpop.f32.mrb[1].mxu1  ;;  %v341_v8 = vpop.f32.mrb[2].mxu0  ;;  %v1256_v3 = vld [vmem:[%s1536_s3 + $0xd0] sm:$0xff]  }
  0xf1   : > { %v415_v9 = vpop.f32.mrb[2].mxu1  ;;  %v1175_v10 = vpop.f32.mrb[3].mxu0 }
  0xf2   : > { %v416_v11 = vadd.f32 %v415_v9, %v341_v8  ;;  %v1189_v12 = vpop.f32.mrb[3].mxu1 }
 0x102   : > { %v499_v18 = vpop.f32.mrb[4].mxu0 }
 0x103   : > { %v506_v20 = vadd.f32 %v499_v18, %v413_v6  ;;  %v1202_v21 = vpop.f32.mrb[5].mxu0  ;;  %v844_v6 = vrot.slane %v842_v2, 1 }
 0x104   : > { %v502_v25 = vpop.f32.mrb[6].mxu0 }
 0x105   : > { %v515_v26 = vadd.f32 %v1072_v19, %v506_v20  ;;  %v507_v27 = vadd.f32 %v502_v25, %v416_v11  ;;  %v1203_v28 = vpop.f32.mrb[7].mxu0 }
 0x107   : > { %v517_v29 = vmax.f32 %v515_v26, 0.0  ;;  %v516_v30 = vadd.f32 %v1072_v19, %v507_v27 }
 0x109   : > { %519 = vst [vmem:[#allocation3 + $0x10] sm:$0xff] %v517_v29  ;;  %v518_v34 = vmax.f32 %v516_v30, 0.0  ;;  %v527_v39 = vpack.c.bf16 %v517_v29, %v521_v35 }
 0x10b   : > { %520 = vst [vmem:[#allocation3 + $0x20] sm:$0xff] %v518_v34  ;;  %v551_v37 = vpack.c.bf16 %v518_v34, %v517_v29  ;;  %v672_v41 = vshrl.u32 %v527_v39, 16  ;;  %v675_v42 = vshll.u32 %v527_v39, 16 }
 0x10d   : > { %662 = vmatmul.mubr.bf16.vlgmr.msra.gmra.mrb[4].mxu1 %v551_v37  ;;  %v674_v46 = vrot.slane %v672_v41, 3  ;;  %v677_v47 = vrot.slane %v675_v42, 4 }
 0x10e   : > { %917 = vmatpush1.bf16.msra.mxu1 %v1247_v36  ;;  %1138 = vmatprep.mubr.msk.bf16.mxu1 %vm232_vm4, %v857_v38 }
 0x10f   : > { %918 = vmatprep.subr.bf16.mxu1 %v1267_v31  ;;  %v678_v53 = vor.u32 %v677_v47, %v674_v46 }
 0x110   : > { %v804_v57 = vld [vmem:[#allocation3 + $0x10] sm:$0xfe] }
 0x111   : > { %v810_v59 = vpack.c.bf16 %v518_v34, %v804_v57 }
 0x112   : > { %919 = vmatpush1.bf16.msra.mxu1 %v1249_v40  ;;  %v525_v43 = vld [vmem:[#allocation3 + $0x20] sm:$0x7f] }
 0x113   : > { %v529_v45 = vpack.c.bf16 %v525_v43, %v525_v43  ;;  %920 = vmatprep.subr.bf16.mxu1 %v1267_v31  ;;  %v837_v63 = vshll.u32 %v810_v59, 16  ;;  %v835_v4 = vshrl.u32 %v810_v59, 16 }
 0x115   : > { %v680_v48 = vshrl.u32 %v529_v45, 16  ;;  %v683_v49 = vshll.u32 %v529_v45, 16  ;;  %v839_v1 = vrot.slane %v837_v63, 1 }
 0x116   : > { %921 = vmatpush1.bf16.msra.mxu1 %v1250_v44 }
 0x117   : > { %v682_v51 = vrot.slane %v680_v48, 3  ;;  %v685_v52 = vrot.slane %v683_v49, 4  ;;  %922 = vmatprep.subr.bf16.mxu1 %v1267_v31  ;;  %v840_v5 = vor.u32 %v839_v1, %v835_v4 }
 0x119   : > { %v686_v54 = vor.u32 %v685_v52, %v682_v51  ;;  %v845_v7 = vsel %vm833_vm6, %v840_v5, %v844_v6 }
 0x11a   : > { %923 = vmatpush1.bf16.msra.mxu1 %v1251_v50 }
 0x11b   : > { %v687_v56 = vsel %vm670_vm5, %v678_v53, %v686_v54  ;;  %924 = vmatprep.subr.bf16.mxu1 %v1267_v31 }
 0x11c   : > { %796 = vmatmul.mubr.bf16.vlgmr.msra.gmra.mrb[8].mxu0 %v687_v56 }
 0x11e   : > { %925 = vmatpush1.bf16.msra.mxu1 %v1252_v55 }
 0x11f   : > { %926 = vmatprep.subr.bf16.mxu1 %v1267_v31 }
 0x122   : > { %927 = vmatpush1.bf16.msra.mxu1 %v1253_v58 }
 0x123   : > { %928 = vmatprep.subr.bf16.mxu1 %v1267_v31 }
 0x126   : > { %929 = vmatpush1.bf16.msra.mxu1 %v1254_v61 }
 0x127   : > { %930 = vmatprep.subr.bf16.mxu1 %v1267_v31 }
 0x12a   : > { %931 = vmatpush1.bf16.msra.mxu1 %v1255_v0 }
 0x12b   : > { %932 = vmatprep.subr.bf16.mxu1 %v1267_v31  ;;  %v1139_v31 = vld [vmem:[%s1537_s4] ss:$0 sm:$0xff] }
 0x12e   : > { %933 = vmatpush1.bf16.msra.mxu1 %v1256_v3 }
 0x131   : > { %949 = vmatmul.mubr.bf16.vlgmr.msra.gmra.mrb[8].mxu1 %v845_v7 }
 0x1e0   : > { %v663_v8 = vpop.f32.mrb[4].mxu1 }
 0x1e1   : > { %v665_v9 = vpop.f32.mrb[5].mxu1 }
 0x1e2   : > { %v666_v10 = vpop.f32.mrb[6].mxu1 }
 0x1e3   : > { %v668_v11 = vpop.f32.mrb[7].mxu1 }
 0x1ef   : > { %v797_v12 = vpop.f32.mrb[8].mxu0 }
 0x1f0   : > { %v798_v13 = vadd.f32 %v797_v12, %v663_v8  ;;  %v799_v14 = vpop.f32.mrb[9].mxu0 }
 0x1f1   : > { %v800_v15 = vpop.f32.mrb[10].mxu0 }
 0x1f2   : > { %v801_v16 = vadd.f32 %v800_v15, %v666_v10  ;;  %v802_v17 = vpop.f32.mrb[11].mxu0 }
 0x204   : > { %v950_v18 = vpop.f32.mrb[8].mxu1 }
 0x205   : > { %v957_v19 = vadd.f32 %v950_v18, %v798_v13  ;;  %v952_v20 = vpop.f32.mrb[9].mxu1 }
 0x206   : > { %v953_v21 = vpop.f32.mrb[10].mxu1 }
 0x207   : > { %v966_v22 = vadd.f32 %v1139_v31, %v957_v19  ;;  %v958_v23 = vadd.f32 %v953_v21, %v801_v16  ;;  %v955_v24 = vpop.f32.mrb[11].mxu1 }
 0x209   : > { %v968_v25 = vmax.f32 %v966_v22, 0.0  ;;  %v967_v26 = vadd.f32 %v1139_v31, %v958_v23 }
 0x20b   : > { %970 = vst [vmem:[%s224_s25] sm:$0xff] %v968_v25  ;;  %v969_v27 = vmax.f32 %v967_v26, 0.0 }
 0x20d   : > { %971 = vst [vmem:[%s224_s25 + $0x8] sm:$0xff] %v969_v27 }
 0x20e PF: > { %s15_s18 = sadd.s32 1, %s1263_s18  }
 0x20f   : > { %p12_p4 = scmp.ge.s32.totalorder %s15_s18, 4  }
 0x211   :  { %14 = sbr.rel (!%p12_p4) target bundleno = 1 (0x1), region = 74 }

</bundles_post_ra>
